<compile_context>
chip_gen: v6e
topology: v6e:2x2x1
jax: 0.10.0
libtpu: 0.0.40
codegen_flags: <defaults>
</compile_context>

<pallas_src>
import functools

import jax
import jax.numpy as jnp
from jax.experimental import pallas as pl
from jax.experimental.pallas import tpu as pltpu

D_ENC = 768   # all-mpnet-base-v2 hidden size
BATCH = 2
SEQ = 8


# =====================================================================
# Fused kernel: masked mean pooling (+ optional L2 normalize)
# grid = (batch tiles [parallel], seq tiles [arbitrary, reduction])
# =====================================================================
def _encoder_kernel(tok_ref, mask_ref, out_ref, sum_acc, den_acc, *, normalize):
    j = pl.program_id(1)

    @pl.when(j == 0)
    def _():
        sum_acc[...] = jnp.zeros_like(sum_acc)
        den_acc[...] = jnp.zeros_like(den_acc)

    # Upcast inside the kernel: bf16 stays bf16 in HBM/VMEM DMA, accumulation is f32.
    tok = tok_ref[...].astype(jnp.float32)            # (tb, ts, D)
    mask = mask_ref[...].astype(jnp.float32)          # (tb, ts, 1)  -> lane splat on multiply

    sum_acc[...] += jnp.sum(tok * mask, axis=1)       # (tb, D)
    den_acc[...] += jnp.sum(mask, axis=1)             # (tb, 1)

    @pl.when(j == pl.num_programs(1) - 1)
    def _():
        summed = sum_acc[...]
        # torch.clamp(input_mask_expanded.sum(1), min=1e-9)
        denom = jnp.maximum(den_acc[...], 1e-9)
        if normalize:
            # Approx (EUP) reciprocal is safe here: the per-row scale cancels
            # exactly under the L2 normalization below.
            pooled = summed * pl.reciprocal(denom, approx=True)
            # F.normalize(p=2, dim=1, eps=1e-12): x / max(||x||, eps)
            #   == x * rsqrt(max(sum(x^2), eps^2))   (rsqrt -> EUP slot)
            sumsq = jnp.sum(pooled * pooled, axis=1, keepdims=True)
            out_ref[...] = (pooled * jax.lax.rsqrt(jnp.maximum(sumsq, 1e-24))
                            ).astype(out_ref.dtype)
        else:
            # Exact reciprocal (still EUP path) so pooled values carry no
            # approximation error when they are returned directly.
            out_ref[...] = (summed * pl.reciprocal(denom, approx=False)
                            ).astype(out_ref.dtype)


def _choose_tiles(B, S, D, itemsize):
    """Pick (tb, ts) so the token-embedding block (double-buffered by the
    pipeline) stays well inside the smallest scoped-VMEM default (v5e: 16 MiB)."""
    budget = 4 * 1024 * 1024   # per tok block; x2 double-buffered ~8 MiB

    def tok_bytes(tb, ts):
        return tb * ts * D * itemsize

    if B <= 8:
        tb_candidates = [B]
    else:
        # keep >= 2 batch grid steps so the "parallel" axis can shard across
        # the two TensorCores on v7x
        tb_cap = max(8, ((B + 1) // 2) // 8 * 8)
        tb_candidates = [t for t in (64, 32, 16, 8) if t <= tb_cap] or [8]

    for tb in tb_candidates:
        if tok_bytes(tb, S) <= budget:
            return tb, S

    # Full-S block too large -> tile the sequence axis (multiple of 128 that
    # divides S, so the mask's lane dim and the reduction stay exact).
    tb = tb_candidates[-1]
    if S % 128 == 0:
        ts = 128
        while ts * 2 <= S and S % (ts * 2) == 0 and tok_bytes(tb, ts * 2) <= budget:
            ts *= 2
        return tb, ts
    return tb, S


def sentence_encoder_forward(token_embeddings, attention_mask, normalize=True):
    """Pooling head of SentenceEncoderRaw.forward as one Pallas kernel.

    token_embeddings: (B, S, D) float (bf16 or f32, fed natively) — backbone output.
    attention_mask:   (B, S)    int/float {0,1}             — tokenizer mask.
    Returns (B, D) float32 sentence embeddings (L2-normalized if normalize=True).
    """
    B, S, D = token_embeddings.shape
    itemsize = jnp.dtype(token_embeddings.dtype).itemsize
    tb, ts = _choose_tiles(B, S, D, itemsize)
    grid = (pl.cdiv(B, tb), pl.cdiv(S, ts))

    # (B, S, 1) mask: broadcast inside the kernel is a lane splat (no relayout).
    # No dtype cast here — cast happens inside the kernel.
    mask3 = attention_mask.reshape(B, S, 1)

    kernel = functools.partial(_encoder_kernel, normalize=normalize)
    return pl.pallas_call(
        kernel,
        out_shape=jax.ShapeDtypeStruct((B, D), jnp.float32),
        grid_spec=pltpu.PrefetchScalarGridSpec(
            num_scalar_prefetch=0,
            grid=grid,
            in_specs=[
                pl.BlockSpec((tb, ts, D), lambda i, j: (i, j, 0)),
                pl.BlockSpec((tb, ts, 1), lambda i, j: (i, j, 0)),
            ],
            out_specs=pl.BlockSpec((tb, D), lambda i, j: (i, 0)),
            scratch_shapes=[
                pltpu.VMEM((tb, D), jnp.float32),   # masked-sum accumulator
                pltpu.VMEM((tb, 1), jnp.float32),   # mask-count accumulator
            ],
        ),
        compiler_params=pltpu.CompilerParams(
            dimension_semantics=("parallel", "arbitrary")),
    )(token_embeddings, mask3)


# =====================================================================
# Pure-JAX reference (mirrors the PyTorch mean_pooling + F.normalize)
# =====================================================================
def _reference(token_embeddings, attention_mask, normalize=True):
    tok = token_embeddings.astype(jnp.float32)
    m = attention_mask.astype(jnp.float32)[:, :, None]
    pooled = jnp.sum(tok * m, axis=1) / jnp.maximum(jnp.sum(m, axis=1), 1e-9)
    if not normalize:
        return pooled
    norm = jnp.sqrt(jnp.sum(pooled * pooled, axis=1, keepdims=True))
    return pooled / jnp.maximum(norm, 1e-12)


if __name__ == "__main__":
    key = jax.random.PRNGKey(0)
    k_tok, k_mask = jax.random.split(key, 2)

    # Synthetic bf16 token embeddings standing in for the black-box transformer
    # output (fed natively — no wrapper-side upcast), plus an int32 mask.
    token_embeddings = jax.random.normal(
        k_tok, (BATCH, SEQ, D_ENC), jnp.float32).astype(jnp.bfloat16)
    attention_mask = (jax.random.uniform(k_mask, (BATCH, SEQ)) > 0.25).astype(jnp.int32)
    attention_mask = attention_mask.at[:, 0].set(1)

    out = sentence_encoder_forward(token_embeddings, attention_mask, normalize=True)
    out_raw = sentence_encoder_forward(token_embeddings, attention_mask, normalize=False)
    jax.block_until_ready((out, out_raw))

    assert out.shape == (BATCH, D_ENC)
    assert out_raw.shape == (BATCH, D_ENC)

    ref = _reference(token_embeddings, attention_mask, normalize=True)
    ref_raw = _reference(token_embeddings, attention_mask, normalize=False)
    assert bool(jnp.all(jnp.abs(out - ref) < 1e-3)), "normalized output mismatch"
    assert bool(jnp.all(jnp.abs(out_raw - ref_raw) < 1e-3)), "pooled output mismatch"
    norms = jnp.linalg.norm(out, axis=1)
    assert bool(jnp.all(jnp.abs(norms - 1.0) < 1e-3)), "rows not unit-norm"

    print("KERNEL_OK")
</pallas_src>

<mosaic_0001>
module attributes {stable_mosaic.version = 11 : i64} {
  func.func @_encoder_kernel(%arg0: i32, %arg1: i32, %arg2: memref<2x8x768xbf16, #tpu.memory_space<vmem>>, %arg3: memref<2x8x1xi32, #tpu.memory_space<vmem>>, %arg4: memref<2x768xf32, #tpu.memory_space<vmem>>, %arg5: memref<2x768xf32, #tpu.memory_space<vmem>>, %arg6: memref<2x1xf32, #tpu.memory_space<vmem>>) attributes {dimension_semantics = [#tpu.dimension_semantics<parallel>, #tpu.dimension_semantics<arbitrary>], iteration_bounds = array<i64: 1, 1>, scalar_prefetch = 0 : i64, scratch_operands = 2 : i64, tpu.core_type = #tpu.core_type<tc>, window_params = [{transform_indices = @transform_0, window_bounds = array<i64: 2, 8, 768>}, {transform_indices = @transform_1, window_bounds = array<i64: 2, 8, 1>}, {transform_indices = @transform_2, window_bounds = array<i64: 2, 768>}]} {
    %c0_i32 = arith.constant 0 : i32
    %0 = arith.cmpi eq, %arg1, %c0_i32 : i32
    %1 = arith.extui %0 : i1 to i32
    %c0_i32_0 = arith.constant 0 : i32
    %2 = arith.cmpi ne, %1, %c0_i32_0 : i32
    scf.if %2 {
      %cst_17 = arith.constant 0.000000e+00 : f32
      %20 = vector.broadcast %cst_17 : f32 to vector<2x768xf32>
      %c0_18 = arith.constant 0 : index
      %c0_19 = arith.constant 0 : index
      %21 = vector.load %arg5[%c0_18, %c0_19] : memref<2x768xf32, #tpu.memory_space<vmem>>, vector<2x768xf32>
      tpu.vector_store %arg5[%c0_18, %c0_19], %20 {strides = array<i32>} : memref<2x768xf32, #tpu.memory_space<vmem>>, vector<2x768xf32>,
      %cst_20 = arith.constant 0.000000e+00 : f32
      %22 = vector.broadcast %cst_20 : f32 to vector<2x1xf32>
      %c0_21 = arith.constant 0 : index
      %c0_22 = arith.constant 0 : index
      %23 = vector.load %arg6[%c0_21, %c0_22] : memref<2x1xf32, #tpu.memory_space<vmem>>, vector<2x1xf32>
      tpu.vector_store %arg6[%c0_21, %c0_22], %22 {strides = array<i32>} : memref<2x1xf32, #tpu.memory_space<vmem>>, vector<2x1xf32>,
    } else {
    }
    %c0 = arith.constant 0 : index
    %c0_1 = arith.constant 0 : index
    %c0_2 = arith.constant 0 : index
    %3 = vector.load %arg2[%c0, %c0_1, %c0_2] : memref<2x8x768xbf16, #tpu.memory_space<vmem>>, vector<2x8x768xbf16>
    %4 = arith.extf %3 : vector<2x8x768xbf16> to vector<2x8x768xf32>
    %c0_3 = arith.constant 0 : index
    %c0_4 = arith.constant 0 : index
    %c0_5 = arith.constant 0 : index
    %5 = vector.load %arg3[%c0_3, %c0_4, %c0_5] : memref<2x8x1xi32, #tpu.memory_space<vmem>>, vector<2x8x1xi32>
    %6 = arith.sitofp %5 : vector<2x8x1xi32> to vector<2x8x1xf32>
    %c0_6 = arith.constant 0 : index
    %c0_7 = arith.constant 0 : index
    %7 = vector.load %arg5[%c0_6, %c0_7] : memref<2x768xf32, #tpu.memory_space<vmem>>, vector<2x768xf32>
    %8 = vector.broadcast %6 : vector<2x8x1xf32> to vector<2x8x768xf32>
    %9 = arith.mulf %4, %8 : vector<2x8x768xf32>
    %cst = arith.constant dense<0.000000e+00> : vector<2x768xf32>
    %10 = vector.multi_reduction <add>, %9, %cst [1] : vector<2x8x768xf32> to vector<2x768xf32>
    %11 = arith.addf %7, %10 : vector<2x768xf32>
    %c0_8 = arith.constant 0 : index
    %c0_9 = arith.constant 0 : index
    %12 = vector.load %arg5[%c0_8, %c0_9] : memref<2x768xf32, #tpu.memory_space<vmem>>, vector<2x768xf32>
    tpu.vector_store %arg5[%c0_8, %c0_9], %11 {strides = array<i32>} : memref<2x768xf32, #tpu.memory_space<vmem>>, vector<2x768xf32>,
    %c0_10 = arith.constant 0 : index
    %c0_11 = arith.constant 0 : index
    %13 = vector.load %arg6[%c0_10, %c0_11] : memref<2x1xf32, #tpu.memory_space<vmem>>, vector<2x1xf32>
    %cst_12 = arith.constant dense<0.000000e+00> : vector<2x1xf32>
    %14 = vector.multi_reduction <add>, %6, %cst_12 [1] : vector<2x8x1xf32> to vector<2x1xf32>
    %15 = arith.addf %13, %14 : vector<2x1xf32>
    %c0_13 = arith.constant 0 : index
    %c0_14 = arith.constant 0 : index
    %16 = vector.load %arg6[%c0_13, %c0_14] : memref<2x1xf32, #tpu.memory_space<vmem>>, vector<2x1xf32>
    tpu.vector_store %arg6[%c0_13, %c0_14], %15 {strides = array<i32>} : memref<2x1xf32, #tpu.memory_space<vmem>>, vector<2x1xf32>,
    %c0_i32_15 = arith.constant 0 : i32
    %17 = arith.cmpi eq, %arg1, %c0_i32_15 : i32
    %18 = arith.extui %17 : i1 to i32
    %c0_i32_16 = arith.constant 0 : i32
    %19 = arith.cmpi ne, %18, %c0_i32_16 : i32
    scf.if %19 {
      %c0_17 = arith.constant 0 : index
      %c0_18 = arith.constant 0 : index
      %20 = vector.load %arg5[%c0_17, %c0_18] : memref<2x768xf32, #tpu.memory_space<vmem>>, vector<2x768xf32>
      %c0_19 = arith.constant 0 : index
      %c0_20 = arith.constant 0 : index
      %21 = vector.load %arg6[%c0_19, %c0_20] : memref<2x1xf32, #tpu.memory_space<vmem>>, vector<2x1xf32>
      %cst_21 = arith.constant 9.99999971E-10 : f32
      %22 = vector.broadcast %cst_21 : f32 to vector<2x1xf32>
      %23 = arith.maximumf %21, %22 : vector<2x1xf32>
      %24 = tpu.reciprocal %23 {approx = true} : vector<2x1xf32> -> vector<2x1xf32>
      %25 = vector.broadcast %24 : vector<2x1xf32> to vector<2x768xf32>
      %26 = arith.mulf %20, %25 : vector<2x768xf32>
      %27 = arith.mulf %26, %26 : vector<2x768xf32>
      %cst_22 = arith.constant dense<0.000000e+00> : vector<2xf32>
      %28 = vector.multi_reduction <add>, %27, %cst_22 [1] : vector<2x768xf32> to vector<2xf32>
      %29 = vector.shape_cast %28 : vector<2xf32> to vector<2x1xf32>
      %cst_23 = arith.constant 1.000000e-24 : f32
      %30 = vector.broadcast %cst_23 : f32 to vector<2x1xf32>
      %31 = arith.maximumf %29, %30 : vector<2x1xf32>
      %32 = math.rsqrt %31 : vector<2x1xf32>
      %33 = vector.broadcast %32 : vector<2x1xf32> to vector<2x768xf32>
      %34 = arith.mulf %26, %33 : vector<2x768xf32>
      %c0_24 = arith.constant 0 : index
      %c0_25 = arith.constant 0 : index
      %35 = vector.load %arg4[%c0_24, %c0_25] : memref<2x768xf32, #tpu.memory_space<vmem>>, vector<2x768xf32>
      tpu.vector_store %arg4[%c0_24, %c0_25], %34 {strides = array<i32>} : memref<2x768xf32, #tpu.memory_space<vmem>>, vector<2x768xf32>,
    } else {
    }
    return
  }
  func.func @transform_0(%arg0: i32, %arg1: i32) -> (i32, i32, i32) {
    %c0_i32 = arith.constant 0 : i32
    %c0_i32_0 = arith.constant 0 : i32
    return %arg0, %arg1, %c0_i32 : i32, i32, i32
  }
  func.func @transform_1(%arg0: i32, %arg1: i32) -> (i32, i32, i32) {
    %c0_i32 = arith.constant 0 : i32
    %c0_i32_0 = arith.constant 0 : i32
    return %arg0, %arg1, %c0_i32 : i32, i32, i32
  }
  func.func @transform_2(%arg0: i32, %arg1: i32) -> (i32, i32) {
    %c0_i32 = arith.constant 0 : i32
    %c0_i32_0 = arith.constant 0 : i32
    return %arg0, %c0_i32 : i32, i32
  }
}

</mosaic_0001>

<bundles_post_ra>
// kernel: tpu_custom_call.1
= control target key start
LH: loop header
LB: loop body
LE: loop exit
PB: predicated region body
PF: predicated region fallthrough
CT: control target
= control target key end

     0   :  { %7 = vsyncpa [#allocation5], 0  ;;  %s483_s0 = inlined_call_operand.hbm [shape: bf16[2,8,768], index: 0, kind: input, shape index: {}]   ;;  %s484_s1 = inlined_call_operand.vmem [shape: s32[2,8,1], index: 1, kind: input, shape index: {}]   ;;  %s485_s2 = inlined_call_operand.hbm [shape: f32[2,768], index: 2, kind: output, shape index: {}]  }
   0x1   :  { %8 = vsyncpa [#allocation6], 0  ;;  %s422_s9 = smov [#allocation4]  }
   0x2   :  { %s14_s10 = sshll.u32 %s422_s9, 4  ;;  %s15_s10 = int_to_ptr.vmem [resolvable:$true] %s14_s10 }
   0x3   :  { %s386_s11 = scalar_lea.vmem %s15_s10, 768  ;;  %p391_p1 = scmp.lt.s32.totalorder %s15_s10, %s15_s10 }
   0x4   :  { %p387_p0 = scmp.ne.s32.totalorder %s15_s10, %s386_s11  ;;  %p392_p2 = scmp.lt.s32.totalorder %s386_s11, %s386_s11 }
   0x6   :  { %p393_p3 = por %p392_p2, %p391_p1 }
   0x8   :  { %p394_p4 = pnand %p393_p3, %p387_p0 }
   0xa   :  { %397 = shalt.err (!%p394_p4)
}
   0xb   :  { %s423_s12 = smov 384   ;;  %s424_s13 = smov 24  }
   0xc   :  { %20 = dma.hbm_to_vmem [thread:$0]  %s483_s0, 768, %s15_s10, [#allocation5], %s423_s12, %s423_s12, %s424_s13  }
   0xd   :  { %418 = dma.done.wait [#allocation5], 768  }
   0xe   :  { %419 = vsyncadd [#allocation5], 4294966528  ;;  %vm32_vm0 = vcmask 1024   ;;  %v425_v0 = vmov 0   ;;  %v426_v1 = vmov 0.0   ;;  %v53_v2 = vld [vmem:[%s484_s1 + $0x8] sm:$0xff]  ;;  %v169_v45 = vlaneseq }
   0xf   :  { %372 = vset.pattern.permute.xlu0 %v425_v0  ;;  %31 = vst [vmem:[#allocation2 + $0x8] sm:$0xf] %v426_v1  ;;  %33 = vst.msk [vmem:[#allocation3] sm:$0x3] %vm32_vm0, %v426_v1  ;;  %373 = vset.pattern.permute.xlu1 %v425_v0  ;;  %vm241_vm1 = vcmask 7168   ;;  %v52_v3 = vld [vmem:[%s484_s1] sm:$0xff]  ;;  %v55_v4 = vcvt.s32.f32 %v53_v2 }
  0x10   :  { %v54_v5 = vcvt.s32.f32 %v52_v3  ;;  %vm219_vm2 = vcmask 1041409   ;;  %v37_v26 = vld [vmem:[#allocation4 + $0x18] sm:$0xff]  ;;  %v38_v27 = vld [vmem:[#allocation4 + $0x20] sm:$0xff]  ;;  %v39_v28 = vld [vmem:[#allocation4 + $0x28] sm:$0xff]  ;;  %v427_v43 = vmov 1983009808  }
  0x11   :  { %65 = vperm.xlu0 %372, %v55_v4   ;;  %v249_v6 = vsel %vm241_vm1, %v55_v4, 0.0  ;;  %v46_v29 = vunpack.c.l.bf16 %v37_v26  ;;  %v34_v30 = vld [vmem:[#allocation4] sm:$0xff]  ;;  %v47_v31 = vunpack.c.h.bf16 %v37_v26  ;;  %v48_v32 = vunpack.c.l.bf16 %v38_v27  ;;  %v35_v34 = vld [vmem:[#allocation4 + $0x8] sm:$0xff]  ;;  %v36_v37 = vld [vmem:[#allocation4 + $0x10] sm:$0xff]  ;;  %s429_s0 = smov [#allocation7]  }
  0x12   :  { %v242_v7 = vsel %vm241_vm1, %v54_v5, 0.0  ;;  %v250_v8 = vrot.slane %v249_v6, 4  ;;  %v49_v33 = vunpack.c.h.bf16 %v38_v27  ;;  %v50_v35 = vunpack.c.l.bf16 %v39_v28  ;;  %s355_s1 = sshll.u32 %s429_s0, 4  ;;  %s356_s1 = int_to_ptr.vmem [resolvable:$true] %s355_s1 }
  0x13   :  { %v243_v9 = vrot.slane %v242_v7, 4  ;;  %v51_v36 = vunpack.c.h.bf16 %v39_v28  ;;  %v40_v38 = vunpack.c.l.bf16 %v34_v30  ;;  %v41_v39 = vunpack.c.h.bf16 %v34_v30  ;;  %s398_s20 = scalar_lea.vmem %s356_s1, 192  ;;  %p403_p6 = scmp.lt.s32.totalorder %s356_s1, %s356_s1 }
  0x14   :  { %v251_v10 = vadd.f32 %v250_v8, %v249_v6  ;;  %v42_v41 = vunpack.c.l.bf16 %v35_v34  ;;  %v43_v42 = vunpack.c.h.bf16 %v35_v34  ;;  %v167_v44 = vunpack.c.l.s4 %v427_v43  ;;  %p399_p5 = scmp.ne.s32.totalorder %s356_s1, %s398_s20  ;;  %p404_p7 = scmp.lt.s32.totalorder %s398_s20, %s398_s20 }
  0x15   :  { %v244_v11 = vadd.f32 %v243_v9, %v242_v7  ;;  %60 = vperm.xlu0 %372, %v54_v5   ;;  %v44_v52 = vunpack.c.l.bf16 %v36_v37  ;;  %v45_v53 = vunpack.c.h.bf16 %v36_v37  ;;  %v457_v62 = vshrl.u32 %v169_v45, 7 }
  0x16   :  { %v252_v12 = vrot.slane %v251_v10, 2  ;;  %v240_v19 = vld [vmem:[#allocation3] sm:$0x3]  ;;  %v168_v61 = vunpack.c.0.s8 %v167_v44  ;;  %vm221_vm3 = vcmask 1043459   ;;  %vm223_vm4 = vcmask 1045509   ;;  %p405_p8 = por %p404_p7, %p403_p6 }
  0x17   :  { %v245_v13 = vrot.slane %v244_v11, 2  ;;  %vm225_vm5 = vcmask 1047559   ;;  %vm320_vm6 = vcmask 1041408  }
  0x18   :  { %v253_v14 = vadd.f32 %v252_v12, %v251_v10  ;;  %v460_v37 = vsub.s32 %v168_v61, %v457_v62  ;;  %p406_p9 = pnand %p405_p8, %p399_p5 }
  0x19   :  { %v246_v15 = vadd.f32 %v245_v13, %v244_v11 }
  0x1a   :  { %v254_v16 = vrot.slane %v253_v14, 1 }
  0x1b   :  { %v247_v17 = vrot.slane %v246_v15, 1 }
  0x1c   :  { %v255_v18 = vadd.f32 %v254_v16, %v253_v14 }
  0x1d   :  { %v248_v20 = vadd.f32 %v247_v17, %v246_v15 }
  0x1f   :  { %v258_v21 = vsel %vm219_vm2, %v255_v18, %v248_v20 }
  0x20   :  { %v260_v22 = vadd.f32 %v258_v21, %v240_v19 }
  0x22   :  { %262 = vst.msk [vmem:[#allocation3] sm:$0x3] %vm32_vm0, %v260_v22 }
  0x29   :  { %v268_v23 = vld [vmem:[#allocation3] sm:$0x3] }
  0x2a   :  { %v269_v24 = vmax.f32 %v268_v23, 1e-09 }
  0x2c   :  { %374 = vrcp.f32 %v269_v24 }
  0x39   :  { %v375_v25 = vpop.eup %374 }
  0x3a   :  { %273 = vperm.xlu1 %373, %v375_v25  }
  0x8c   :  { %v66_v40 = vpop.permute.xlu0 %65 }
  0x8d   :  { %v74_v46 = vmul.f32 %v66_v40, %v46_v29  ;;  %v75_v47 = vmul.f32 %v66_v40, %v47_v31  ;;  %v76_v48 = vmul.f32 %v66_v40, %v48_v32  ;;  %v77_v49 = vmul.f32 %v66_v40, %v49_v33 }
  0x8e   :  { %v78_v50 = vmul.f32 %v66_v40, %v50_v35  ;;  %v79_v51 = vmul.f32 %v66_v40, %v51_v36 }
  0x8f   :  { %v116_v54 = vrot.slane %v74_v46, 4  ;;  %v122_v55 = vrot.slane %v75_v47, 4  ;;  %v128_v56 = vrot.slane %v76_v48, 4  ;;  %v134_v57 = vrot.slane %v77_v49, 4 }
  0x90   :  { %v140_v58 = vrot.slane %v78_v50, 4  ;;  %v146_v59 = vrot.slane %v79_v51, 4  ;;  %v61_v60 = vpop.permute.xlu0 %60 }
  0x91   :  { %v117_v63 = vadd.f32 %v116_v54, %v74_v46  ;;  %v123_v0 = vadd.f32 %v122_v55, %v75_v47  ;;  %v129_v1 = vadd.f32 %v128_v56, %v76_v48  ;;  %v135_v2 = vadd.f32 %v134_v57, %v77_v49 }
  0x92   :  { %v141_v3 = vadd.f32 %v140_v58, %v78_v50  ;;  %v147_v4 = vadd.f32 %v146_v59, %v79_v51  ;;  %v68_v5 = vmul.f32 %v61_v60, %v40_v38  ;;  %v69_v6 = vmul.f32 %v61_v60, %v41_v39 }
  0x93   :  { %v118_v7 = vrot.slane %v117_v63, 2  ;;  %v124_v8 = vrot.slane %v123_v0, 2  ;;  %v130_v9 = vrot.slane %v129_v1, 2  ;;  %v136_v10 = vrot.slane %v135_v2, 2 }
  0x94   :  { %v142_v11 = vrot.slane %v141_v3, 2  ;;  %v148_v12 = vrot.slane %v147_v4, 2  ;;  %v70_v13 = vmul.f32 %v61_v60, %v42_v41  ;;  %v71_v14 = vmul.f32 %v61_v60, %v43_v42 }
  0x95   :  { %v119_v15 = vadd.f32 %v118_v7, %v117_v63  ;;  %v125_v16 = vadd.f32 %v124_v8, %v123_v0  ;;  %v131_v17 = vadd.f32 %v130_v9, %v129_v1  ;;  %v137_v18 = vadd.f32 %v136_v10, %v135_v2 }
  0x96   :  { %v143_v19 = vadd.f32 %v142_v11, %v141_v3  ;;  %v149_v20 = vadd.f32 %v148_v12, %v147_v4  ;;  %v72_v21 = vmul.f32 %v61_v60, %v44_v52  ;;  %v73_v22 = vmul.f32 %v61_v60, %v45_v53 }
  0x97   :  { %v120_v23 = vrot.slane %v119_v15, 1  ;;  %v126_v24 = vrot.slane %v125_v16, 1  ;;  %v132_v25 = vrot.slane %v131_v17, 1  ;;  %v138_v26 = vrot.slane %v137_v18, 1 }
  0x98   :  { %v144_v27 = vrot.slane %v143_v19, 1  ;;  %v150_v28 = vrot.slane %v149_v20, 1  ;;  %v80_v29 = vrot.slane %v68_v5, 4  ;;  %v86_v30 = vrot.slane %v69_v6, 4 }
  0x99   :  { %v121_v31 = vadd.f32 %v120_v23, %v119_v15  ;;  %v127_v32 = vadd.f32 %v126_v24, %v125_v16  ;;  %v133_v33 = vadd.f32 %v132_v25, %v131_v17  ;;  %v139_v34 = vadd.f32 %v138_v26, %v137_v18 }
  0x9a   :  { %v81_v35 = vadd.f32 %v80_v29, %v68_v5  ;;  %v87_v36 = vadd.f32 %v86_v30, %v69_v6  ;;  %v145_v38 = vadd.f32 %v144_v27, %v143_v19  ;;  %v151_v39 = vadd.f32 %v150_v28, %v149_v20 }
  0x9b   :  { %v92_v40 = vrot.slane %v70_v13, 4  ;;  %v98_v41 = vrot.slane %v71_v14, 4  ;;  %v189_v42 = vcombine.low %v121_v31, %v127_v32  ;;  %v104_v45 = vrot.slane %v72_v21, 4  ;;  %v57_v32 = vld [vmem:[#allocation2 + $0x8] sm:$0xf] }
  0x9c   :  { %v82_v43 = vrot.slane %v81_v35, 2  ;;  %v88_v44 = vrot.slane %v87_v36, 2  ;;  %v190_v46 = vcombine.low %v133_v33, %v139_v34  ;;  %v110_v49 = vrot.slane %v73_v22, 4 }
  0x9d   :  { %v93_v47 = vadd.f32 %v92_v40, %v70_v13  ;;  %v99_v48 = vadd.f32 %v98_v41, %v71_v14  ;;  %v105_v52 = vadd.f32 %v104_v45, %v72_v21  ;;  %v206_v53 = vcombine.low %v145_v38, %v151_v39 }
  0x9e   :  { %v83_v50 = vadd.f32 %v82_v43, %v81_v35  ;;  %v89_v51 = vadd.f32 %v88_v44, %v87_v36  ;;  %v111_v56 = vadd.f32 %v110_v49, %v73_v22  ;;  %v197_v60 = vrot.slane %v189_v42, %v460_v37 }
  0x9f   :  { %v94_v54 = vrot.slane %v93_v47, 2  ;;  %v100_v55 = vrot.slane %v99_v48, 2  ;;  %v106_v59 = vrot.slane %v105_v52, 2  ;;  %v204_v1 = vrot.slane %v190_v46, %v460_v37 }
  0xa0   :  { %v84_v57 = vrot.slane %v83_v50, 1  ;;  %v90_v58 = vrot.slane %v89_v51, 1  ;;  %v112_v0 = vrot.slane %v111_v56, 2  ;;  %v213_v10 = vrot.slane %v206_v53, %v460_v37 }
  0xa1   :  { %v95_v61 = vadd.f32 %v94_v54, %v93_v47  ;;  %v101_v63 = vadd.f32 %v100_v55, %v99_v48  ;;  %v107_v4 = vadd.f32 %v106_v59, %v105_v52  ;;  %v205_v14 = vcombine.low %v197_v60, %v204_v1 }
  0xa2   :  { %v85_v2 = vadd.f32 %v84_v57, %v83_v50  ;;  %v91_v3 = vadd.f32 %v90_v58, %v89_v51  ;;  %v113_v7 = vadd.f32 %v112_v0, %v111_v56  ;;  %v428_v19 = vmov 269488144  }
  0xa3   :  { %v96_v5 = vrot.slane %v95_v61, 1  ;;  %v102_v6 = vrot.slane %v101_v63, 1  ;;  %v108_v8 = vrot.slane %v107_v4, 1  ;;  %v276_v20 = vunpack.c.l.s4 %v428_v19 }
  0xa4   :  { %v164_v9 = vcombine.low %v85_v2, %v91_v3  ;;  %v114_v13 = vrot.slane %v113_v7, 1  ;;  %v218_v23 = vrot.slane %v205_v14, 7  ;;  %v229_v24 = vrot.slane %v213_v10, 7 }
  0xa5   :  { %v97_v11 = vadd.f32 %v96_v5, %v95_v61  ;;  %v103_v12 = vadd.f32 %v102_v6, %v101_v63  ;;  %v109_v15 = vadd.f32 %v108_v8, %v107_v4  ;;  %v277_v29 = vunpack.c.0.s8 %v276_v20 }
  0xa6   :  { %v115_v16 = vadd.f32 %v114_v13, %v113_v7  ;;  %v172_v18 = vrot.slane %v164_v9, %v460_v37 }
  0xa7   :  { %v165_v17 = vcombine.low %v97_v11, %v103_v12  ;;  %v280_v38 = vsub.s32 %v277_v29, %v457_v62 }
  0xa8   :  { %v181_v21 = vcombine.low %v109_v15, %v115_v16 }
  0xa9   :  { %v179_v22 = vrot.slane %v165_v17, %v460_v37 }
  0xaa   :  { %v188_v26 = vrot.slane %v181_v21, %v460_v37 }
  0xab   :  { %v180_v25 = vcombine.low %v172_v18, %v179_v22 }
  0xac   :  { %v230_v28 = vsel %vm219_vm2, %v229_v24, %v188_v26 }
  0xad   :  { %v220_v27 = vsel %vm219_vm2, %v218_v23, %v180_v25  ;;  %v231_v31 = vsel %vm221_vm3, %v229_v24, %v230_v28 }
  0xae   :  { %v222_v30 = vsel %vm221_vm3, %v218_v23, %v220_v27  ;;  %v232_v34 = vsel %vm223_vm4, %v229_v24, %v231_v31 }
  0xaf   :  { %v224_v33 = vsel %vm223_vm4, %v218_v23, %v222_v30  ;;  %v233_v36 = vsel %vm225_vm5, %v229_v24, %v232_v34 }
  0xb0   :  { %v226_v35 = vsel %vm225_vm5, %v218_v23, %v224_v33  ;;  %v237_v39 = vadd.f32 %v233_v36, %v57_v32 }
  0xb2   :  { %239 = vst [vmem:[#allocation2 + $0x8] sm:$0xf] %v237_v39 }
  0xb5   :  { %v274_v40 = vpop.permute.xlu1 %273 }
  0xb6   :  { %v281_v41 = vrot.slane %v274_v40, %v280_v38 }
  0xb8   :  { %v283_v42 = vmul.f32 %v281_v41, %v226_v35 }
  0xb9   :  { %v267_v44 = vld [vmem:[#allocation2 + $0x8] sm:$0xf] }
  0xba   :  { %v285_v43 = vmul.f32 %v283_v42, %v283_v42  ;;  %v284_v45 = vmul.f32 %v281_v41, %v267_v44 }
  0xbc   :  { %v289_v46 = vcombine.high %v285_v43, %v285_v43  ;;  %v296_v47 = vrot.slane %v285_v43, %v460_v37  ;;  %v286_v48 = vmul.f32 %v284_v45, %v284_v45 }
  0xbe   :  { %v303_v49 = vrot.slane %v289_v46, %v460_v37  ;;  %v304_v50 = vcombine.high %v296_v47, %v296_v47  ;;  %v321_v51 = vsel %vm320_vm6, %v296_v47, 0.0  ;;  %v312_v62 = vrot.slane %v286_v48, %v460_v37 }
  0xc0   :  { %v305_v52 = vcombine.high %v303_v49, %v303_v49  ;;  %v322_v53 = vsel %vm320_vm6, %v304_v50, 0.0  ;;  %v324_v55 = vsel %vm320_vm6, %v303_v49, 0.0  ;;  %v313_v57 = vcombine.high %v312_v62, %v312_v62 }
  0xc1   :  { %v323_v54 = vadd.f32 %v322_v53, %v321_v51  ;;  %v328_v60 = vsel %vm320_vm6, %v312_v62, 0.0 }
  0xc2   :  { %v326_v58 = vsel %vm320_vm6, %v305_v52, 0.0  ;;  %v330_v63 = vsel %vm320_vm6, %v313_v57, 0.0 }
  0xc3   :  { %v325_v56 = vadd.f32 %v324_v55, %v323_v54 }
  0xc5   :  { %v327_v59 = vadd.f32 %v326_v58, %v325_v56 }
  0xc7   :  { %v329_v61 = vadd.f32 %v328_v60, %v327_v59 }
  0xc9   :  { %v331_v0 = vadd.f32 %v330_v63, %v329_v61 }
  0xcb   :  { %332 = vadd.xlane.f32.xlu1 %v331_v0 }
 0x154   :  { %v333_v1 = vpop.xlane.xlu1 %332 }
 0x155   :  { %v334_v2 = vmax.f32 %v333_v1, 1e-24 }
 0x157   :  { %376 = vrsqrt.f32 %v334_v2 }
 0x164   :  { %v377_v37 = vpop.eup %376 }
 0x165   :  { %v343_v3 = vrot.slane %v377_v37, %v280_v38 }
 0x167   :  { %v345_v4 = vmul.f32 %v343_v3, %v283_v42  ;;  %v346_v5 = vmul.f32 %v343_v3, %v284_v45 }
 0x169   :  { %347 = vst [vmem:[#allocation7] sm:$0xff] %v345_v4  ;;  %348 = vst [vmem:[#allocation7 + $0x8] sm:$0xf] %v346_v5 }
 0x16a   :  { %409 = shalt.err (!%p406_p9)
}
 0x16b   :  { %358 = dma.vmem_to_hbm [thread:$0]  %s356_s1, 192, %s485_s2, [#allocation6]  }
 0x16c   :  { %420 = dma.done.wait [#allocation6], 192  }
 0x16d   :  { %421 = vsyncadd [#allocation6], 4294967104 }
 0x16e   :  { %362 = vsyncpa [#allocation5], 1 }
 0x16f   :  { %363 = vsyncpa [#allocation6], 1 }

</bundles_post_ra>
